<compile_context>
chip_gen: v7x
topology: tpu7x:2x2x1
jax: 0.10.0
libtpu: 0.0.40
codegen_flags: <defaults>
</compile_context>

<pallas_src>
import math

import jax
import jax.numpy as jnp
from jax.experimental import pallas as pl
from jax.experimental.pallas import tpu as pltpu

_LANE = 128


def _denoise_kernel(w_ref, x_ref, o_ref):
    """out = sigma_prior^2 / (sigma_prior^2 + sigma_meas^2) on one (tb, tf) tile.

    The (1, tf) weight row stays in f32; all math is done in f32 and cast to
    the output dtype only at the final store.  The divide is expressed as an
    EUP reciprocal so it does not expand into VALU Newton-Raphson work.
    """
    w = w_ref[...]                                  # (1, tf) f32 sigma_prior
    a = w * w                                       # sigma_prior^2
    x = x_ref[...].astype(jnp.float32)              # (tb, tf) measurement variance
    o_ref[...] = (a * pl.reciprocal(a + x, approx=False)).astype(o_ref.dtype)


def _round_down(v, m):
    return (v // m) * m


def _round_up(v, m):
    return ((v + m - 1) // m) * m


def _vmem_capacity_bytes():
    try:
        return int(pltpu.get_tpu_info().vmem_capacity_bytes)
    except Exception:
        return 64 * 1024 * 1024  # conservative (v7x-sized) fallback


def _choose_tiles(B, F, in_isz, out_isz, buf_budget, min_steps):
    """Pick lane-dense (tb, tf) tiles that fit a double-buffered VMEM budget."""
    sublane = max(8, 32 // max(in_isz, 1))   # 8 for f32, 16 for bf16/f16, 32 for 8-bit
    per_elem = 2 * in_isz + 2 * out_isz      # double-buffered input + output

    def max_rows(tf):
        return max(buf_budget // (tf * per_elem), 1)

    # Feature tile: full F by default (one lane-dense slab per row block).
    tf = F
    tb = min(B, max_rows(tf))
    if tb < B:
        tb = max(_round_down(tb, sublane), sublane)
    # Cap the row tile so a large problem gets at least `min_steps` grid steps
    # (read/write overlap + megacore sharding); never below one sublane tile.
    if min_steps > 1:
        cap = _round_up(pl.cdiv(B, min_steps), sublane)
        if cap < tb:
            tb = max(cap, sublane)
    nb = pl.cdiv(B, tb)
    nf = 1

    # Small-B / huge-F: split the feature axis (128-lane multiples only) to
    # recover pipelining depth while keeping every store lane-dense.
    if nb < min_steps and F % _LANE == 0 and F >= 2 * _LANE:
        want_nf = min(pl.cdiv(min_steps, nb), F // _LANE)
        tf = max(_round_down(F // want_nf, _LANE), _LANE)
        nf = pl.cdiv(F, tf)
        tb = min(B, max_rows(tf))
        if tb < B:
            tb = max(_round_down(tb, sublane), sublane)
        nb = pl.cdiv(B, tb)

    return tb, tf, nb, nf


def denoise_layer_apply(sigma_meas_squared, weight, *, vmem_capacity_bytes=None):
    """out = weight**2 / (weight**2 + sigma_meas_squared), broadcast on leading dims.

    Args:
      sigma_meas_squared: (*, in_features) measurement variance.
      weight:             (in_features,) standard-deviation prior (NOT squared).
    Returns:
      (*, in_features) multiplicative Wiener filter, in the input's dtype.
    """
    orig_shape = sigma_meas_squared.shape
    F = orig_shape[-1]
    weight = jnp.asarray(weight).reshape(-1)
    if weight.size != F:
        raise ValueError(
            f"The last dimension of the input tensor ({F}) should be equal to "
            f"the number of input features ({weight.size})."
        )

    x = sigma_meas_squared.reshape(-1, F)
    B = x.shape[0]
    out_dtype = x.dtype
    # Keep the prior in f32: w^2 ~ 4/F is tiny; squaring in bf16 loses precision.
    w2d = weight.reshape(1, F).astype(jnp.float32)

    in_isz = jnp.dtype(x.dtype).itemsize
    out_isz = jnp.dtype(out_dtype).itemsize

    # Generation-aware VMEM budget: v7x has 64 MiB/TC, v5e/v6e have 128 MiB.
    cap = int(vmem_capacity_bytes) if vmem_capacity_bytes else _vmem_capacity_bytes()
    vmem_limit = int(0.75 * cap)   # scoped limit requested from the compiler
    buf_budget = int(0.60 * cap)   # footprint our double-buffered tiles may use

    total_bytes = B * F * (in_isz + out_isz)
    if total_bytes >= 8 * 1024 * 1024:
        min_steps = 8          # overlap DMA-in/compute/DMA-out + v7x dual-core
    elif total_bytes >= 2 * 1024 * 1024:
        min_steps = 2
    else:
        min_steps = 1          # tiny problems: one step, no per-step overhead

    tb, tf, nb, nf = _choose_tiles(B, F, in_isz, out_isz, buf_budget, min_steps)

    cost = pl.CostEstimate(
        flops=3 * B * F,                         # square + add + mul-by-reciprocal
        transcendentals=B * F,                   # EUP reciprocal
        bytes_accessed=(in_isz + out_isz) * B * F + 4 * F,
    )

    out = pl.pallas_call(
        _denoise_kernel,
        out_shape=jax.ShapeDtypeStruct((B, F), out_dtype),
        grid_spec=pltpu.PrefetchScalarGridSpec(
            num_scalar_prefetch=0,
            grid=(nb, nf),
            in_specs=[
                # Tiny weight row: re-used across all row blocks of a feature block.
                pl.BlockSpec((1, tf), lambda i, j: (0, j)),
                pl.BlockSpec((tb, tf), lambda i, j: (i, j)),
            ],
            out_specs=pl.BlockSpec((tb, tf), lambda i, j: (i, j)),
        ),
        compiler_params=pltpu.CompilerParams(
            dimension_semantics=("parallel", "parallel"),
            vmem_limit_bytes=vmem_limit,
        ),
        cost_estimate=cost,
    )(w2d, x)

    return out.reshape(orig_shape)


if __name__ == "__main__":
    key = jax.random.PRNGKey(0)
    k_w, k_x, k_w2, k_x2, k_w3, k_x3 = jax.random.split(key, 6)

    # --- Case 1: canonical small shape, f32, lane-dense F -------------------
    B, F = 64, 128
    weight = jax.random.uniform(k_w, (F,), jnp.float32, 0.0, 2.0 / math.sqrt(F))
    sigma_meas_sq = jax.random.uniform(k_x, (B, F), jnp.float32, 0.0, 1.0)
    out = jax.block_until_ready(denoise_layer_apply(sigma_meas_sq, weight))
    ref = (weight ** 2) / (weight ** 2 + sigma_meas_sq)
    assert out.shape == (B, F)
    assert jnp.allclose(out, ref, atol=1e-6, rtol=1e-5)

    # --- Case 2: extra leading batch dims + non-lane-dense F ----------------
    shape2, F2 = (5, 7, 48), 48
    weight2 = jax.random.uniform(k_w2, (F2,), jnp.float32, 0.0, 2.0 / math.sqrt(F2))
    x2 = jax.random.uniform(k_x2, shape2, jnp.float32, 0.0, 1.0)
    out2 = jax.block_until_ready(denoise_layer_apply(x2, weight2))
    ref2 = (weight2 ** 2) / (weight2 ** 2 + x2)
    assert out2.shape == shape2
    assert jnp.allclose(out2, ref2, atol=1e-6, rtol=1e-5)

    # --- Case 3: bf16 input, f32 weight/math, bf16 output -------------------
    B3, F3 = 40, 256
    weight3 = jax.random.uniform(k_w3, (F3,), jnp.float32, 0.0, 2.0 / math.sqrt(F3))
    x3 = jax.random.uniform(k_x3, (B3, F3), jnp.float32, 0.0, 1.0).astype(jnp.bfloat16)
    out3 = jax.block_until_ready(denoise_layer_apply(x3, weight3))
    ref3 = ((weight3 ** 2) / (weight3 ** 2 + x3.astype(jnp.float32))).astype(jnp.bfloat16)
    assert out3.shape == (B3, F3)
    assert jnp.allclose(out3.astype(jnp.float32), ref3.astype(jnp.float32),
                        atol=1e-2, rtol=2e-2)

    print("KERNEL_OK")
</pallas_src>

<mosaic_0001>
module attributes {stable_mosaic.version = 11 : i64} {
  func.func @_denoise_kernel(%arg0: i32, %arg1: i32, %arg2: memref<1x128xf32, #tpu.memory_space<vmem>>, %arg3: memref<64x128xf32, #tpu.memory_space<vmem>>, %arg4: memref<64x128xf32, #tpu.memory_space<vmem>>) attributes {dimension_semantics = [#tpu.dimension_semantics<parallel>, #tpu.dimension_semantics<parallel>], iteration_bounds = array<i64: 1, 1>, scalar_prefetch = 0 : i64, scratch_operands = 0 : i64, tpu.core_type = #tpu.core_type<tc>, window_params = [{transform_indices = @transform_0, window_bounds = array<i64: 1, 128>}, {transform_indices = @transform_1, window_bounds = array<i64: 64, 128>}, {transform_indices = @transform_2, window_bounds = array<i64: 64, 128>}]} {
    %c0 = arith.constant 0 : index
    %c0_0 = arith.constant 0 : index
    %0 = vector.load %arg2[%c0, %c0_0] : memref<1x128xf32, #tpu.memory_space<vmem>>, vector<1x128xf32>
    %1 = arith.mulf %0, %0 : vector<1x128xf32>
    %c0_1 = arith.constant 0 : index
    %c0_2 = arith.constant 0 : index
    %2 = vector.load %arg3[%c0_1, %c0_2] : memref<64x128xf32, #tpu.memory_space<vmem>>, vector<64x128xf32>
    %3 = vector.broadcast %1 : vector<1x128xf32> to vector<64x128xf32>
    %4 = arith.addf %3, %2 : vector<64x128xf32>
    %5 = tpu.reciprocal %4 : vector<64x128xf32> -> vector<64x128xf32>
    %6 = vector.broadcast %1 : vector<1x128xf32> to vector<64x128xf32>
    %7 = arith.mulf %6, %5 : vector<64x128xf32>
    %c0_3 = arith.constant 0 : index
    %c0_4 = arith.constant 0 : index
    %8 = vector.load %arg4[%c0_3, %c0_4] : memref<64x128xf32, #tpu.memory_space<vmem>>, vector<64x128xf32>
    tpu.vector_store %arg4[%c0_3, %c0_4], %7 {strides = array<i32>} : memref<64x128xf32, #tpu.memory_space<vmem>>, vector<64x128xf32>,
    return
  }
  func.func @transform_0(%arg0: i32, %arg1: i32) -> (i32, i32) {
    %c0_i32 = arith.constant 0 : i32
    %c0_i32_0 = arith.constant 0 : i32
    return %c0_i32, %arg1 : i32, i32
  }
  func.func @transform_1(%arg0: i32, %arg1: i32) -> (i32, i32) {
    %c0_i32 = arith.constant 0 : i32
    return %arg0, %arg1 : i32, i32
  }
  func.func @transform_2(%arg0: i32, %arg1: i32) -> (i32, i32) {
    %c0_i32 = arith.constant 0 : i32
    return %arg0, %arg1 : i32, i32
  }
}

</mosaic_0001>

<bundles_post_ra>
// kernel: tpu_custom_call.1
= control target key start
LH: loop header
LB: loop body
LE: loop exit
PB: predicated region body
PF: predicated region fallthrough
CT: control target
= control target key end

     0   :  { %7 = vsyncpa [#allocation3], 0  ;;  %s266_s0 = inlined_call_operand.hbm [shape: f32[1,128], index: 0, kind: input, shape index: {}]   ;;  %s267_s1 = inlined_call_operand.hbm [shape: f32[64,128], index: 1, kind: input, shape index: {}]   ;;  %s268_s2 = inlined_call_operand.hbm [shape: f32[64,128], index: 2, kind: output, shape index: {}]  }
   0x1   :  { %8 = vsyncpa [#allocation6], 0 }
   0x2   :  { %9 = vsyncpa [#allocation4], 0  ;;  %s197_s9 = smov [#allocation2]   ;;  %s198_s11 = smov [#allocation5]  }
   0x3   :  { %s16_s10 = sshll.u32 %s197_s9, 4  ;;  %s25_s12 = sshll.u32 %s198_s11, 4  ;;  %s17_s10 = int_to_ptr.vmem [resolvable:$true] %s16_s10  ;;  %s217_s12 = int_to_ptr.vmem [resolvable:$true] %s25_s12 }
   0x4   :  { %s125_s15 = scalar_lea.hbm %s266_s0, 16 }
   0x5   :  { %p126_p0 = scmp.ne.s32.totalorder %s266_s0, %s125_s15  ;;  %p129_p1 = scmp.lt.u32.totalorder %s125_s15, %s266_s0 }
   0x7   :  { %p131_p2 = pnand %p129_p1, %p126_p0 }
   0x9   :  { %134 = shalt.err (!%p131_p2)
}
   0xa   :  { %s135_s20 = scalar_lea.vmem %s17_s10, 16  ;;  %s139_s21 = scalar_lea.vmem %s17_s10, 32 }
   0xb   :  { %p136_p3 = scmp.ne.s32.totalorder %s17_s10, %s135_s20  ;;  %p140_p4 = scmp.lt.s32.totalorder %s17_s10, %s17_s10 }
   0xc   :  { %p141_p5 = scmp.lt.s32.totalorder %s139_s21, %s135_s20 }
   0xe   :  { %p142_p6 = por %p141_p5, %p140_p4 }
  0x10   :  { %p143_p7 = pnand %p142_p6, %p136_p3 }
  0x12   :  { %146 = shalt.err (!%p143_p7)
}
  0x13   :  { %19 = dma.hbm_to_vmem [thread:$0]  %s266_s0, 16, %s17_s10, [#allocation3]  }
  0x14   :  { %s147_s26 = scalar_lea.hbm %s267_s1, 1024 }
  0x15   :  { %p148_p8 = scmp.ne.s32.totalorder %s267_s1, %s147_s26  ;;  %p151_p9 = scmp.lt.u32.totalorder %s147_s26, %s267_s1 }
  0x17   :  { %p153_p10 = pnand %p151_p9, %p148_p8 }
  0x19   :  { %156 = shalt.err (!%p153_p10)
}
  0x1a   :  { %s157_s3 = scalar_lea.vmem %s217_s12, 1024  ;;  %p162_p12 = scmp.lt.s32.totalorder %s217_s12, %s217_s12 }
  0x1b   :  { %p158_p11 = scmp.ne.s32.totalorder %s217_s12, %s157_s3  ;;  %p163_p13 = scmp.lt.s32.totalorder %s157_s3, %s157_s3 }
  0x1d   :  { %p164_p0 = por %p163_p13, %p162_p12 }
  0x1f   :  { %p165_p1 = pnand %p164_p0, %p158_p11 }
  0x21   :  { %168 = shalt.err (!%p165_p1)
}
  0x22   :  { %s199_s0 = smov 128   ;;  %s200_s4 = smov 8  }
  0x23   :  { %31 = dma.hbm_to_vmem [thread:$0]  %s267_s1, 1024, %s217_s12, [#allocation6], %s199_s0, %s199_s0, %s200_s4  }
  0x24   :  { %191 = dma.done.wait [#allocation3], 16  }
  0x25   :  { %192 = vsyncadd [#allocation3], 4294967280 }
  0x26   :  { %193 = dma.done.wait [#allocation6], 1024  }
  0x27   :  { %194 = vsyncadd [#allocation6], 4294966272  ;;  %v49_v0 = vlaneseq  ;;  %v38_v3 = vld [vmem:[#allocation2] sm:$0x1]  ;;  %v40_v5 = vld [vmem:[#allocation5] sm:$0xff]  ;;  %s201_s1 = smov [#allocation7]  }
  0x28   :  { %v39_v4 = vmul.f32 %v38_v3, %v38_v3  ;;  %v41_v6 = vld [vmem:[#allocation5 + $0x8] sm:$0xff]  ;;  %v42_v7 = vld [vmem:[#allocation5 + $0x10] sm:$0xff]  ;;  %v43_v9 = vld [vmem:[#allocation5 + $0x18] sm:$0xff]  ;;  %s91_s7 = sshll.u32 %s201_s1, 4  ;;  %s92_s7 = int_to_ptr.vmem [resolvable:$true] %s91_s7 }
  0x29   :  { %v50_v1 = vshrl.u32 %v49_v0, 7  ;;  %v44_v10 = vld [vmem:[#allocation5 + $0x20] sm:$0xff]  ;;  %v45_v14 = vld [vmem:[#allocation5 + $0x28] sm:$0xff]  ;;  %v46_v16 = vld [vmem:[#allocation5 + $0x30] sm:$0xff]  ;;  %s169_s8 = scalar_lea.vmem %s92_s7, 1024  ;;  %p174_p3 = scmp.lt.s32.totalorder %s92_s7, %s92_s7 }
  0x2a   :  { %v47_v18 = vld [vmem:[#allocation5 + $0x38] sm:$0xff]  ;;  %p170_p2 = scmp.ne.s32.totalorder %s92_s7, %s169_s8  ;;  %p175_p4 = scmp.lt.s32.totalorder %s169_s8, %s169_s8 }
  0x2b   :  { %v51_v2 = vsub.s32 0, %v50_v1 }
  0x2c   :  { %p176_p5 = por %p175_p4, %p174_p3 }
  0x2d   :  { %v52_v8 = vrot.slane %v39_v4, %v51_v2 }
  0x2e   :  { %p177_p6 = pnand %p176_p5, %p170_p2 }
  0x2f   :  { %v54_v11 = vadd.f32 %v52_v8, %v40_v5  ;;  %v55_v12 = vadd.f32 %v52_v8, %v41_v6  ;;  %v56_v13 = vadd.f32 %v52_v8, %v42_v7  ;;  %v57_v15 = vadd.f32 %v52_v8, %v43_v9 }
  0x30   :  { %v58_v17 = vadd.f32 %v52_v8, %v44_v10  ;;  %v59_v19 = vadd.f32 %v52_v8, %v45_v14  ;;  %v60_v20 = vadd.f32 %v52_v8, %v46_v16  ;;  %v61_v21 = vadd.f32 %v52_v8, %v47_v18 }
  0x31   :  { %109 = vrcp.f32 %v54_v11 }
  0x32   :  { %111 = vrcp.f32 %v55_v12 }
  0x33   :  { %113 = vrcp.f32 %v56_v13 }
  0x34   :  { %115 = vrcp.f32 %v57_v15 }
  0x35   :  { %117 = vrcp.f32 %v58_v17 }
  0x36   :  { %119 = vrcp.f32 %v59_v19 }
  0x37   :  { %121 = vrcp.f32 %v60_v20 }
  0x38   :  { %123 = vrcp.f32 %v61_v21 }
  0x3b   :  { %v110_v22 = vpop.eup %109 }
  0x3c   :  { %v112_v23 = vpop.eup %111  ;;  %v70_v24 = vmul.f32 %v110_v22, %v52_v8 }
  0x3d   :  { %v114_v25 = vpop.eup %113  ;;  %v71_v26 = vmul.f32 %v112_v23, %v52_v8 }
  0x3e   :  { %v116_v27 = vpop.eup %115  ;;  %78 = vst [vmem:[#allocation7] sm:$0xff] %v70_v24  ;;  %v72_v28 = vmul.f32 %v114_v25, %v52_v8 }
  0x3f   :  { %v118_v29 = vpop.eup %117  ;;  %79 = vst [vmem:[#allocation7 + $0x8] sm:$0xff] %v71_v26  ;;  %v73_v30 = vmul.f32 %v116_v27, %v52_v8 }
  0x40   :  { %v120_v31 = vpop.eup %119  ;;  %80 = vst [vmem:[#allocation7 + $0x10] sm:$0xff] %v72_v28  ;;  %v74_v32 = vmul.f32 %v118_v29, %v52_v8 }
  0x41   :  { %v122_v33 = vpop.eup %121  ;;  %81 = vst [vmem:[#allocation7 + $0x18] sm:$0xff] %v73_v30  ;;  %v75_v34 = vmul.f32 %v120_v31, %v52_v8 }
  0x42   :  { %v124_v35 = vpop.eup %123  ;;  %82 = vst [vmem:[#allocation7 + $0x20] sm:$0xff] %v74_v32  ;;  %v76_v36 = vmul.f32 %v122_v33, %v52_v8 }
  0x43   :  { %83 = vst [vmem:[#allocation7 + $0x28] sm:$0xff] %v75_v34  ;;  %v77_v37 = vmul.f32 %v124_v35, %v52_v8 }
  0x44   :  { %84 = vst [vmem:[#allocation7 + $0x30] sm:$0xff] %v76_v36 }
  0x45   :  { %85 = vst [vmem:[#allocation7 + $0x38] sm:$0xff] %v77_v37 }
  0x46   :  { %180 = shalt.err (!%p177_p6)
}
  0x47   :  { %s181_s11 = scalar_lea.hbm %s268_s2, 1024 }
  0x48   :  { %p182_p7 = scmp.ne.s32.totalorder %s268_s2, %s181_s11  ;;  %p185_p8 = scmp.lt.u32.totalorder %s181_s11, %s268_s2 }
  0x4a   :  { %p187_p9 = pnand %p185_p8, %p182_p7 }
  0x4c   :  { %190 = shalt.err (!%p187_p9)
}
  0x4d   :  { %97 = dma.vmem_to_hbm [thread:$0]  %s92_s7, 1024, %s268_s2, [#allocation4], %s199_s0, %s199_s0, %s200_s4  }
  0x4e   :  { %195 = dma.done.wait [#allocation4], 1024  }
  0x4f   :  { %196 = vsyncadd [#allocation4], 4294966272 }
  0x50   :  { %101 = vsyncpa [#allocation3], 1 }
  0x51   :  { %102 = vsyncpa [#allocation6], 1 }
  0x52   :  { %103 = vsyncpa [#allocation4], 1 }

</bundles_post_ra>
